<compile_context>
chip_gen: v6e
topology: v6e:2x2x1
jax: 0.10.0
libtpu: 0.0.40
codegen_flags: <defaults>
</compile_context>

<pallas_src>
import functools

import jax
import jax.numpy as jnp
from jax.experimental import pallas as pl
from jax.experimental.pallas import tpu as pltpu

_SUBLANE = 8  # sublane width (second-to-last dim granularity)


def _round_up(x: int, m: int) -> int:
    return (x + m - 1) // m * m


def mlp_kernel(x_ref, w1_ref, b1_ref, w2_ref, b2_ref, o_ref):
    # fc1: (tb, in) @ (in, hid) -> MXU matmul with f32 accumulation.
    h = jnp.dot(x_ref[...], w1_ref[...], preferred_element_type=jnp.float32)
    # bias + ReLU on the VPU.
    h = jnp.maximum(h + b1_ref[...], 0.0)
    # fc2: (tb, hid) @ (hid, out); keep the f32 accumulator through the bias add.
    y = jnp.dot(h, w2_ref[...], preferred_element_type=jnp.float32)
    o_ref[...] = (y + b2_ref[...]).astype(o_ref.dtype)


@functools.partial(jax.jit, static_argnames=("block_b",))
def skin_condition_forward(x, w1, b1, w2, b2, *, block_b=1024):
    """Forward pass of SkinConditionModel.

    x:  (B, input_size)            float32
    w1: (input_size, hidden)       float32   (transposed vs PyTorch's (out, in))
    b1: (hidden,)                  float32
    w2: (hidden, output_size)      float32
    b2: (output_size,)             float32
    """
    B, in_size = x.shape
    hid = w1.shape[1]
    out_size = w2.shape[1]

    # Robustness: batch tile must be a multiple of 8 (sublane constraint).
    block_b = max(_SUBLANE, _round_up(block_b, _SUBLANE))

    # Pad batch to the sublane boundary only (<= 7 dead rows).
    b_p = _round_up(B, _SUBLANE)

    # Batch tile: big (block_b) to amortize per-step overhead on v5e/v6e, but
    # capped so that the grid has >= 2 "parallel" steps whenever b_p >= 16,
    # letting v7x shard the batch across both TensorCores.
    if b_p >= 2 * _SUBLANE:
        tb = min(block_b, _round_up(pl.cdiv(b_p, 2), _SUBLANE))
    else:
        tb = b_p
    grid = (pl.cdiv(b_p, tb),)  # ragged last block handled by clamped DMA

    x_p = x if b_p == B else jnp.pad(x, ((0, b_p - B), (0, 0)))
    b1_2d = b1.reshape(1, hid)      # free (metadata-only) reshape
    b2_2d = b2.reshape(1, out_size)

    out = pl.pallas_call(
        mlp_kernel,
        out_shape=jax.ShapeDtypeStruct((b_p, out_size), jnp.float32),
        grid_spec=pltpu.PrefetchScalarGridSpec(
            num_scalar_prefetch=0,
            grid=grid,
            in_specs=[
                # x: tiled along the batch grid axis; full-extent feature dim.
                pl.BlockSpec((tb, in_size), lambda i: (i, 0)),
                # Weights / biases: constant index map -> VMEM-resident across
                # grid steps (no redundant HBM traffic). Full-extent blocks, so
                # no padding is ever needed.
                pl.BlockSpec((in_size, hid), lambda i: (0, 0)),
                pl.BlockSpec((1, hid), lambda i: (0, 0)),
                pl.BlockSpec((hid, out_size), lambda i: (0, 0)),
                pl.BlockSpec((1, out_size), lambda i: (0, 0)),
            ],
            out_specs=pl.BlockSpec((tb, out_size), lambda i: (i, 0)),
        ),
        compiler_params=pltpu.CompilerParams(
            # Batch axis is independent -> pipeline DMA vs compute, and shard
            # across both TensorCores on v7x.
            dimension_semantics=("parallel",),
        ),
    )(x_p, w1, b1_2d, w2, b2_2d)

    # Drop the (at most 7) sublane-padding rows.
    return out[:B] if b_p != B else out


def init_linear_params(key, in_features, out_features):
    # Mimic torch.nn.Linear default init: U(-1/sqrt(in), 1/sqrt(in)).
    kw, kb = jax.random.split(key)
    bound = 1.0 / jnp.sqrt(jnp.float32(in_features))
    # Stored as (in, out) so the kernel does x @ W directly.
    w = jax.random.uniform(kw, (in_features, out_features), jnp.float32, -bound, bound)
    b = jax.random.uniform(kb, (out_features,), jnp.float32, -bound, bound)
    return w, b


def reference_forward(x, w1, b1, w2, b2):
    h = jnp.maximum(x @ w1 + b1[None, :], 0.0)
    return h @ w2 + b2[None, :]


if __name__ == "__main__":
    # Small shapes consistent with the module:
    # Linear(input_size, hidden_size) -> ReLU -> Linear(hidden_size, output_size)
    batch, input_size, hidden_size, output_size = 8, 32, 64, 16

    key = jax.random.PRNGKey(0)
    kx, k1, k2 = jax.random.split(key, 3)

    x = jax.random.normal(kx, (batch, input_size), jnp.float32)
    w1, b1 = init_linear_params(k1, input_size, hidden_size)
    w2, b2 = init_linear_params(k2, hidden_size, output_size)

    out = skin_condition_forward(x, w1, b1, w2, b2)
    out = jax.block_until_ready(out)

    ref = reference_forward(x, w1, b1, w2, b2)
    assert out.shape == (batch, output_size), out.shape
    assert jnp.allclose(out, ref, atol=1e-5, rtol=1e-5), "mismatch vs reference"

    print("KERNEL_OK")
</pallas_src>

<mosaic_0001>
module attributes {stable_mosaic.version = 11 : i64} {
  func.func @mlp_kernel(%arg0: i32, %arg1: memref<8x32xf32, #tpu.memory_space<vmem>>, %arg2: memref<32x64xf32, #tpu.memory_space<vmem>>, %arg3: memref<1x64xf32, #tpu.memory_space<vmem>>, %arg4: memref<64x16xf32, #tpu.memory_space<vmem>>, %arg5: memref<1x16xf32, #tpu.memory_space<vmem>>, %arg6: memref<8x16xf32, #tpu.memory_space<vmem>>) attributes {dimension_semantics = [#tpu.dimension_semantics<parallel>], iteration_bounds = array<i64: 1>, scalar_prefetch = 0 : i64, scratch_operands = 0 : i64, tpu.core_type = #tpu.core_type<tc>, window_params = [{transform_indices = @transform_0, window_bounds = array<i64: 8, 32>}, {pipeline_mode = #tpu.pipeline_mode<synchronous>, transform_indices = @transform_1, window_bounds = array<i64: 32, 64>}, {pipeline_mode = #tpu.pipeline_mode<synchronous>, transform_indices = @transform_2, window_bounds = array<i64: 1, 64>}, {pipeline_mode = #tpu.pipeline_mode<synchronous>, transform_indices = @transform_3, window_bounds = array<i64: 64, 16>}, {pipeline_mode = #tpu.pipeline_mode<synchronous>, transform_indices = @transform_4, window_bounds = array<i64: 1, 16>}, {transform_indices = @transform_5, window_bounds = array<i64: 8, 16>}]} {
    %c0 = arith.constant 0 : index
    %c0_0 = arith.constant 0 : index
    %0 = vector.load %arg1[%c0, %c0_0] : memref<8x32xf32, #tpu.memory_space<vmem>>, vector<8x32xf32>
    %c0_1 = arith.constant 0 : index
    %c0_2 = arith.constant 0 : index
    %1 = vector.load %arg2[%c0_1, %c0_2] : memref<32x64xf32, #tpu.memory_space<vmem>>, vector<32x64xf32>
    %cst = arith.constant dense<0.000000e+00> : vector<8x64xf32>
    %2 = tpu.matmul %0, %1, %cst {dimension_numbers = #tpu.dot_dimension_numbers<[1], [0], [0], [1], [0, 0, 1, 1], [], []>} : vector<8x32xf32>, vector<32x64xf32>, vector<8x64xf32> -> vector<8x64xf32>
    %c0_3 = arith.constant 0 : index
    %c0_4 = arith.constant 0 : index
    %3 = vector.load %arg3[%c0_3, %c0_4] : memref<1x64xf32, #tpu.memory_space<vmem>>, vector<1x64xf32>
    %4 = vector.broadcast %3 : vector<1x64xf32> to vector<8x64xf32>
    %5 = arith.addf %2, %4 : vector<8x64xf32>
    %cst_5 = arith.constant 0.000000e+00 : f32
    %6 = vector.broadcast %cst_5 : f32 to vector<8x64xf32>
    %7 = arith.maximumf %5, %6 : vector<8x64xf32>
    %c0_6 = arith.constant 0 : index
    %c0_7 = arith.constant 0 : index
    %8 = vector.load %arg4[%c0_6, %c0_7] : memref<64x16xf32, #tpu.memory_space<vmem>>, vector<64x16xf32>
    %cst_8 = arith.constant dense<0.000000e+00> : vector<8x16xf32>
    %9 = tpu.matmul %7, %8, %cst_8 {dimension_numbers = #tpu.dot_dimension_numbers<[1], [0], [0], [1], [0, 0, 1, 1], [], []>} : vector<8x64xf32>, vector<64x16xf32>, vector<8x16xf32> -> vector<8x16xf32>
    %c0_9 = arith.constant 0 : index
    %c0_10 = arith.constant 0 : index
    %10 = vector.load %arg5[%c0_9, %c0_10] : memref<1x16xf32, #tpu.memory_space<vmem>>, vector<1x16xf32>
    %11 = vector.broadcast %10 : vector<1x16xf32> to vector<8x16xf32>
    %12 = arith.addf %9, %11 : vector<8x16xf32>
    %c0_11 = arith.constant 0 : index
    %c0_12 = arith.constant 0 : index
    %13 = vector.load %arg6[%c0_11, %c0_12] : memref<8x16xf32, #tpu.memory_space<vmem>>, vector<8x16xf32>
    tpu.vector_store %arg6[%c0_11, %c0_12], %12 {strides = array<i32>} : memref<8x16xf32, #tpu.memory_space<vmem>>, vector<8x16xf32>,
    return
  }
  func.func @transform_0(%arg0: i32) -> (i32, i32) {
    %c0_i32 = arith.constant 0 : i32
    %c0_i32_0 = arith.constant 0 : i32
    return %arg0, %c0_i32 : i32, i32
  }
  func.func @transform_1(%arg0: i32) -> (i32, i32) {
    %c0_i32 = arith.constant 0 : i32
    %c0_i32_0 = arith.constant 0 : i32
    %c0_i32_1 = arith.constant 0 : i32
    return %c0_i32, %c0_i32_0 : i32, i32
  }
  func.func @transform_2(%arg0: i32) -> (i32, i32) {
    %c0_i32 = arith.constant 0 : i32
    %c0_i32_0 = arith.constant 0 : i32
    %c0_i32_1 = arith.constant 0 : i32
    return %c0_i32, %c0_i32_0 : i32, i32
  }
  func.func @transform_3(%arg0: i32) -> (i32, i32) {
    %c0_i32 = arith.constant 0 : i32
    %c0_i32_0 = arith.constant 0 : i32
    %c0_i32_1 = arith.constant 0 : i32
    return %c0_i32, %c0_i32_0 : i32, i32
  }
  func.func @transform_4(%arg0: i32) -> (i32, i32) {
    %c0_i32 = arith.constant 0 : i32
    %c0_i32_0 = arith.constant 0 : i32
    %c0_i32_1 = arith.constant 0 : i32
    return %c0_i32, %c0_i32_0 : i32, i32
  }
  func.func @transform_5(%arg0: i32) -> (i32, i32) {
    %c0_i32 = arith.constant 0 : i32
    %c0_i32_0 = arith.constant 0 : i32
    return %arg0, %c0_i32 : i32, i32
  }
}

</mosaic_0001>

<bundles_post_ra>
// kernel: skin_condition_forward.1
= control target key start
LH: loop header
LB: loop body
LE: loop exit
PB: predicated region body
PF: predicated region fallthrough
CT: control target
= control target key end

     0   :  { %v286_v1 = vmov 0.0   ;;  %vm287_vm0 = vmmov 0   ;;  %s369_s0 = inlined_call_operand.vmem [shape: f32[8,32], index: 0, kind: input, shape index: {}]   ;;  %s370_s1 = inlined_call_operand.vmem [shape: f32[32,64], index: 1, kind: input, shape index: {}]   ;;  %s371_s2 = inlined_call_operand.vmem [shape: f32[1,64], index: 2, kind: input, shape index: {}]   ;;  %s372_s3 = inlined_call_operand.vmem [shape: f32[64,16], index: 3, kind: input, shape index: {}]   ;;  %s373_s4 = inlined_call_operand.vmem [shape: f32[1,16], index: 4, kind: input, shape index: {}]   ;;  %s374_s5 = inlined_call_operand.hbm [shape: f32[8,16], index: 5, kind: output, shape index: {}]  }
   0x1   :  { %v25_v0 = vld [vmem:[%s370_s1 + $0x18] sm:$0xff]  ;;  %231 = vmatprep.subr.mxu0 %v286_v1  ;;  %v24_v2 = vld [vmem:[%s370_s1 + $0x10] sm:$0xff]  ;;  %239 = vmatprep.mubr.msk.f32.mxu0 %vm287_vm0, %v286_v1  ;;  %v23_v5 = vld [vmem:[%s370_s1 + $0x8] sm:$0xff] }
   0x2   :  { %v115_v3 = vld [vmem:[%s372_s3 + $0x38] sm:$0xff]  ;;  %232 = vmatpush3.msra.mxu0 %v25_v0  ;;  %242 = vmatprep.subr.mxu1 %v286_v1  ;;  %v114_v4 = vld [vmem:[%s372_s3 + $0x30] sm:$0xff] }
   0x3   :  { %233 = vmatprep.subr.mxu0 %v286_v1  ;;  %243 = vmatpush3.msra.mxu1 %v115_v3 }
   0x4   :  { %10 = vsyncpa [#allocation3], 0  ;;  %234 = vmatpush3.msra.mxu0 %v24_v2  ;;  %244 = vmatprep.subr.mxu1 %v286_v1  ;;  %v113_v6 = vld [vmem:[%s372_s3 + $0x28] sm:$0xff]  ;;  %v22_v7 = vld [vmem:[%s370_s1] sm:$0xff]  ;;  %vm33_vm1 = vcmask 261120   ;;  %vm123_vm2 = vcmask 523264  }
   0x5   :  { %235 = vmatprep.subr.mxu0 %v286_v1  ;;  %245 = vmatpush3.msra.mxu1 %v114_v4  ;;  %v21_v8 = vld [vmem:[%s369_s0] sm:$0xff]  ;;  %v111_v10 = vld [vmem:[%s372_s3 + $0x18] sm:$0xff]  ;;  %v110_v11 = vld [vmem:[%s372_s3 + $0x10] sm:$0xff]  ;;  %s288_s21 = smov [#allocation2]   ;;  %vm197_vm3 = vcmask 130048  }
   0x6   :  { %236 = vmatpush3.msra.mxu0 %v23_v5  ;;  %246 = vmatprep.subr.mxu1 %v286_v1  ;;  %v112_v9 = vld [vmem:[%s372_s3 + $0x20] sm:$0xff]  ;;  %v109_v12 = vld [vmem:[%s372_s3 + $0x8] sm:$0xff]  ;;  %s205_s22 = sshll.u32 %s288_s21, 4  ;;  %s206_s22 = int_to_ptr.vmem [resolvable:$true] %s205_s22 }
   0x7   :  { %237 = vmatprep.subr.mxu0 %v286_v1  ;;  %247 = vmatpush3.msra.mxu1 %v113_v6  ;;  %v108_v13 = vld [vmem:[%s372_s3] sm:$0xff]  ;;  %s264_s3 = scalar_lea.vmem %s206_s22, 128  ;;  %p269_p1 = scmp.lt.s32.totalorder %s206_s22, %s206_s22 }
   0x8   :  { %238 = vmatpush3.msra.mxu0 %v22_v7  ;;  %248 = vmatprep.subr.mxu1 %v286_v1  ;;  %v213_v14 = vld [vmem:[%s371_s2] ss:$0 sm:$0xff]  ;;  %p265_p0 = scmp.ne.s32.totalorder %s206_s22, %s264_s3  ;;  %p270_p2 = scmp.lt.s32.totalorder %s264_s3, %s264_s3 }
   0x9   :  { %240 = vmatmul.mubr.msk.f32.vlgmr.msra.gmra.mxu0 %vm33_vm1, %v21_v8  ;;  %249 = vmatpush3.msra.mxu1 %v112_v9  ;;  %v215_v19 = vld [vmem:[%s373_s4] ss:$0 sm:$0xff] }
   0xa   :  { %250 = vmatprep.subr.mxu1 %v286_v1  ;;  %258 = vmatprep.mubr.msk.f32.mxu1 %vm287_vm0, %v286_v1  ;;  %p271_p3 = por %p270_p2, %p269_p1 }
   0xb   :  { %251 = vmatpush3.msra.mxu1 %v111_v10 }
   0xc   :  { %252 = vmatprep.subr.mxu1 %v286_v1  ;;  %p272_p4 = pnand %p271_p3, %p265_p0 }
   0xd   :  { %253 = vmatpush3.msra.mxu1 %v110_v11 }
   0xe   :  { %254 = vmatprep.subr.mxu1 %v286_v1 }
   0xf   :  { %255 = vmatpush3.msra.mxu1 %v109_v12 }
  0x10   :  { %256 = vmatprep.subr.mxu1 %v286_v1 }
  0x11   :  { %257 = vmatpush3.msra.mxu1 %v108_v13 }
  0xc9   :  { %v103_v15 = vpop.f32.mrf.mxu0 }
  0xca   :  { %v104_v16 = vadd.f32 %v213_v14, %v103_v15 }
  0xcb   :  { %v241_v17 = vpop.f32.mrf.mxu0 }
  0xcc   :  { %v107_v18 = vmax.f32 %v104_v16, 0.0 }
  0xce   :  { %259 = vmatmul.mubr.msk.f32.vlgmr.msra.gmra.mxu1 %vm123_vm2, %v107_v18 }
 0x18e   :  { %v193_v20 = vpop.f32.mrf.mxu1 }
 0x18f   :  { %v194_v21 = vadd.f32 %v215_v19, %v193_v20 }
 0x190   :  { %v260_v22 = vpop.f32.mrf.mxu1 }
 0x191   :  { %198 = vst.msk [vmem:[#allocation2] sm:$0xff] %vm197_vm3, %v194_v21 }
 0x192   :  { %275 = shalt.err (!%p272_p4)
}
 0x193   :  { %208 = dma.vmem_to_hbm [thread:$0]  %s206_s22, 128, %s374_s5, [#allocation3]  }
 0x194   :  { %284 = dma.done.wait [#allocation3], 128  }
 0x195   :  { %285 = vsyncadd [#allocation3], 4294967168 }
 0x196   :  { %212 = vsyncpa [#allocation3], 1 }

</bundles_post_ra>
